<compile_context>
chip_gen: v7x
topology: tpu7x:2x2x1
jax: 0.10.0
libtpu: 0.0.40
codegen_flags: <defaults>
</compile_context>

<pallas_src>
import functools

import jax
import jax.numpy as jnp
import numpy as np
from jax.experimental import pallas as pl
from jax.experimental.pallas import tpu as pltpu

EPS = 1e-5


def bottleneck_kernel(x_ref, w1_ref, g1_ref, be1_ref,
                      w2_ref, g2_ref, be2_ref,
                      w3_ref, g3_ref, be3_ref,
                      mask_ref, out_ref, im2col_ref, *, W):
    Cin, M = x_ref.shape
    Cmid = w1_ref.shape[0]

    def bn(y, g_ref, be_ref):
        # training-mode BN over the flattened (N,H,W) lane axis, biased var.
        mu = jnp.mean(y, axis=1, keepdims=True)                       # (C, 1)
        var = jnp.mean((y - mu) ** 2, axis=1, keepdims=True)          # (C, 1)
        scale = g_ref[...] * jax.lax.rsqrt(var + EPS)                 # (C, 1)
        return y * scale + (be_ref[...] - mu * scale)                 # fused

    x = x_ref[...]                                                    # (Cin, M)

    # ---- conv1 (1x1) + BN1 + ReLU : single channel matmul ----
    y1 = jnp.dot(w1_ref[...], x, preferred_element_type=jnp.float32)  # (Cmid, M)
    y1 = jnp.maximum(bn(y1, g1_ref, be1_ref), 0.0)

    # ---- conv2 (3x3, stride=1, pad=1) as ONE im2col matmul ----
    # im2col rows are tap-major then channel; tap (dy, dx) is a lane roll of
    # the flattened (n, h, w) axis by -((dy-1)*W + (dx-1)), zeroed at borders.
    for dy in range(3):
        for dx in range(3):
            t = dy * 3 + dx
            delta = (dy - 1) * W + (dx - 1)
            if delta == 0:
                shifted = y1                                          # centre tap
            else:
                shifted = pltpu.roll(y1, shift=(-delta) % M, axis=1)
                shifted = shifted * mask_ref[t:t + 1, :]              # zero halo
            im2col_ref[pl.ds(t * Cmid, Cmid), :] = shifted
    # (Cmid, 9*Cmid) @ (9*Cmid, M) -> (Cmid, M)
    y2 = jnp.dot(w2_ref[...], im2col_ref[...],
                 preferred_element_type=jnp.float32)
    y2 = jnp.maximum(bn(y2, g2_ref, be2_ref), 0.0)

    # ---- conv3 (1x1) + BN3 + residual add + ReLU ----
    y3 = jnp.dot(w3_ref[...], y2, preferred_element_type=jnp.float32)  # (Cexp, M)
    y3 = bn(y3, g3_ref, be3_ref)
    out_ref[...] = jnp.maximum(y3 + x, 0.0).astype(out_ref.dtype)


def _border_masks(N, H, W):
    """(9, N*H*W) float masks: 1 where the shifted source pixel is in-bounds."""
    M = N * H * W
    idx = np.arange(M)
    h = (idx // W) % H
    w = idx % W
    masks = np.zeros((9, M), np.float32)
    for dy in range(3):
        for dx in range(3):
            oy, ox = dy - 1, dx - 1
            valid = (h + oy >= 0) & (h + oy < H) & (w + ox >= 0) & (w + ox < W)
            masks[dy * 3 + dx] = valid.astype(np.float32)
    return jnp.asarray(masks)


def bottleneck_forward(x_nchw, p):
    N, Cin, H, W = x_nchw.shape
    Cmid = p['w1'].shape[0]
    Cexp = p['w3'].shape[0]
    M = N * H * W
    assert Cexp == Cin, "identity residual path requires Cexp == Cin"

    # NCHW -> channel-major, lane-dense (C, N*H*W)
    x_cm = jnp.transpose(x_nchw, (1, 0, 2, 3)).reshape(Cin, M)

    out_cm = pl.pallas_call(
        functools.partial(bottleneck_kernel, W=W),
        out_shape=jax.ShapeDtypeStruct((Cexp, M), jnp.float32),
        in_specs=[pl.BlockSpec(memory_space=pltpu.MemorySpace.VMEM)] * 11,
        out_specs=pl.BlockSpec(memory_space=pltpu.MemorySpace.VMEM),
        scratch_shapes=[pltpu.VMEM((9 * Cmid, M), jnp.float32)],   # im2col buffer
    )(x_cm,
      p['w1'], p['g1'], p['be1'],
      p['w2f'], p['g2'], p['be2'],
      p['w3'], p['g3'], p['be3'],
      p['masks'])

    return jnp.transpose(out_cm.reshape(Cexp, N, H, W), (1, 0, 2, 3))


# ---------------- pure-JAX reference (mirrors the PyTorch forward) ----------------
def ref_bottleneck(x, w1_oihw, b1, w2_oihw, b2, w3_oihw, b3,
                   g1, be1, g2, be2, g3, be3):
    def conv(x, w, b, pad):
        y = jax.lax.conv_general_dilated(
            x, w, (1, 1), [(pad, pad), (pad, pad)],
            dimension_numbers=('NCHW', 'OIHW', 'NCHW'))
        return y + b.reshape(1, -1, 1, 1)

    def bn(y, g, be):
        mu = y.mean(axis=(0, 2, 3), keepdims=True)
        var = ((y - mu) ** 2).mean(axis=(0, 2, 3), keepdims=True)
        return (g.reshape(1, -1, 1, 1) * (y - mu) / jnp.sqrt(var + EPS)
                + be.reshape(1, -1, 1, 1))

    identity = x
    y = jax.nn.relu(bn(conv(x, w1_oihw, b1, 0), g1, be1))
    y = jax.nn.relu(bn(conv(y, w2_oihw, b2, 1), g2, be2))
    y = bn(conv(y, w3_oihw, b3, 0), g3, be3)
    return jax.nn.relu(y + identity)


if __name__ == "__main__":
    # Bottleneck(in_channels=16, out_channels=4, stride=1, i_downsample=None)
    # expansion = 4  =>  output channels = 16 = in_channels (residual add works).
    N, Cin, H, W = 2, 16, 16, 16
    Cmid, Cexp = 4, 16
    M = N * H * W

    key = jax.random.PRNGKey(0)
    ks = jax.random.split(key, 8)
    x = jax.random.normal(ks[0], (N, Cin, H, W), jnp.float32)

    # deterministic parameter init (PyTorch conv weight layout OIHW)
    w1_oihw = 0.1 * jax.random.normal(ks[1], (Cmid, Cin, 1, 1), jnp.float32)
    b1 = 0.1 * jax.random.normal(ks[2], (Cmid,), jnp.float32)
    w2_oihw = 0.1 * jax.random.normal(ks[3], (Cmid, Cmid, 3, 3), jnp.float32)
    b2 = 0.1 * jax.random.normal(ks[4], (Cmid,), jnp.float32)
    w3_oihw = 0.1 * jax.random.normal(ks[5], (Cexp, Cmid, 1, 1), jnp.float32)
    b3 = 0.1 * jax.random.normal(ks[6], (Cexp,), jnp.float32)
    # BatchNorm affine init per PyTorch: gamma=1, beta=0
    g1, be1 = jnp.ones((Cmid,)), jnp.zeros((Cmid,))
    g2, be2 = jnp.ones((Cmid,)), jnp.zeros((Cmid,))
    g3, be3 = jnp.ones((Cexp,)), jnp.zeros((Cexp,))

    # kernel-side parameter layouts (channel-major; conv biases dropped — they
    # cancel exactly under the training-mode batch norm that follows each conv)
    params = dict(
        w1=w1_oihw[:, :, 0, 0],                                       # (Cmid, Cin)
        g1=g1.reshape(Cmid, 1), be1=be1.reshape(Cmid, 1),
        w2f=jnp.transpose(w2_oihw, (0, 2, 3, 1)).reshape(Cmid, 9 * Cmid),
        g2=g2.reshape(Cmid, 1), be2=be2.reshape(Cmid, 1),
        w3=w3_oihw[:, :, 0, 0],                                       # (Cexp, Cmid)
        g3=g3.reshape(Cexp, 1), be3=be3.reshape(Cexp, 1),
        masks=_border_masks(N, H, W),                                 # (9, M)
    )

    out = jax.jit(bottleneck_forward)(x, params)
    out = jax.block_until_ready(out)

    ref = ref_bottleneck(x, w1_oihw, b1, w2_oihw, b2, w3_oihw, b3,
                         g1, be1, g2, be2, g3, be3)

    assert out.shape == (N, Cexp, H, W)
    assert jnp.allclose(out, ref, atol=2e-3, rtol=2e-3), \
        f"max abs err {jnp.max(jnp.abs(out - ref))}"

    print("KERNEL_OK")
</pallas_src>

<mosaic_0001>
module attributes {stable_mosaic.version = 11 : i64} {
  func.func @bottleneck_kernel(%arg0: memref<16x512xf32, #tpu.memory_space<vmem>>, %arg1: memref<4x16xf32, #tpu.memory_space<vmem>>, %arg2: memref<4x1xf32, #tpu.memory_space<vmem>>, %arg3: memref<4x1xf32, #tpu.memory_space<vmem>>, %arg4: memref<4x36xf32, #tpu.memory_space<vmem>>, %arg5: memref<4x1xf32, #tpu.memory_space<vmem>>, %arg6: memref<4x1xf32, #tpu.memory_space<vmem>>, %arg7: memref<16x4xf32, #tpu.memory_space<vmem>>, %arg8: memref<16x1xf32, #tpu.memory_space<vmem>>, %arg9: memref<16x1xf32, #tpu.memory_space<vmem>>, %arg10: memref<9x512xf32, #tpu.memory_space<vmem>>, %arg11: memref<16x512xf32, #tpu.memory_space<vmem>>, %arg12: memref<36x512xf32, #tpu.memory_space<vmem>>) attributes {dimension_semantics = [], scalar_prefetch = 0 : i64, scratch_operands = 1 : i64, tpu.core_type = #tpu.core_type<tc>} {
    %c0 = arith.constant 0 : index
    %c0_0 = arith.constant 0 : index
    %0 = vector.load %arg0[%c0, %c0_0] : memref<16x512xf32, #tpu.memory_space<vmem>>, vector<16x512xf32>
    %c0_1 = arith.constant 0 : index
    %c0_2 = arith.constant 0 : index
    %1 = vector.load %arg1[%c0_1, %c0_2] : memref<4x16xf32, #tpu.memory_space<vmem>>, vector<4x16xf32>
    %cst = arith.constant dense<0.000000e+00> : vector<4x512xf32>
    %2 = tpu.matmul %1, %0, %cst {dimension_numbers = #tpu.dot_dimension_numbers<[1], [0], [0], [1], [0, 0, 1, 1], [], []>} : vector<4x16xf32>, vector<16x512xf32>, vector<4x512xf32> -> vector<4x512xf32>
    %cst_3 = arith.constant dense<0.000000e+00> : vector<4xf32>
    %3 = vector.multi_reduction <add>, %2, %cst_3 [1] : vector<4x512xf32> to vector<4xf32>
    %4 = vector.shape_cast %3 : vector<4xf32> to vector<4x1xf32>
    %cst_4 = arith.constant 5.120000e+02 : f32
    %5 = vector.broadcast %cst_4 : f32 to vector<4x1xf32>
    %6 = arith.divf %4, %5 : vector<4x1xf32>
    %7 = vector.broadcast %6 : vector<4x1xf32> to vector<4x512xf32>
    %8 = arith.subf %2, %7 : vector<4x512xf32>
    %9 = arith.mulf %8, %8 : vector<4x512xf32>
    %cst_5 = arith.constant dense<0.000000e+00> : vector<4xf32>
    %10 = vector.multi_reduction <add>, %9, %cst_5 [1] : vector<4x512xf32> to vector<4xf32>
    %11 = vector.shape_cast %10 : vector<4xf32> to vector<4x1xf32>
    %cst_6 = arith.constant 5.120000e+02 : f32
    %12 = vector.broadcast %cst_6 : f32 to vector<4x1xf32>
    %13 = arith.divf %11, %12 : vector<4x1xf32>
    %c0_7 = arith.constant 0 : index
    %c0_8 = arith.constant 0 : index
    %14 = vector.load %arg2[%c0_7, %c0_8] : memref<4x1xf32, #tpu.memory_space<vmem>>, vector<4x1xf32>
    %cst_9 = arith.constant 9.99999974E-6 : f32
    %15 = vector.broadcast %cst_9 : f32 to vector<4x1xf32>
    %16 = arith.addf %13, %15 : vector<4x1xf32>
    %17 = math.rsqrt %16 : vector<4x1xf32>
    %18 = arith.mulf %14, %17 : vector<4x1xf32>
    %19 = vector.broadcast %18 : vector<4x1xf32> to vector<4x512xf32>
    %20 = arith.mulf %2, %19 : vector<4x512xf32>
    %c0_10 = arith.constant 0 : index
    %c0_11 = arith.constant 0 : index
    %21 = vector.load %arg3[%c0_10, %c0_11] : memref<4x1xf32, #tpu.memory_space<vmem>>, vector<4x1xf32>
    %22 = arith.mulf %6, %18 : vector<4x1xf32>
    %23 = arith.subf %21, %22 : vector<4x1xf32>
    %24 = vector.broadcast %23 : vector<4x1xf32> to vector<4x512xf32>
    %25 = arith.addf %20, %24 : vector<4x512xf32>
    %cst_12 = arith.constant 0.000000e+00 : f32
    %26 = vector.broadcast %cst_12 : f32 to vector<4x512xf32>
    %27 = arith.maximumf %25, %26 : vector<4x512xf32>
    %c17_i32 = arith.constant 17 : i32
    %28 = tpu.dynamic_rotate %27 by %c17_i32 dim 1 : vector<4x512xf32>, i32 -> vector<4x512xf32>
    %c0_13 = arith.constant 0 : index
    %c0_14 = arith.constant 0 : index
    %29 = vector.load %arg10[%c0_13, %c0_14] : memref<9x512xf32, #tpu.memory_space<vmem>>, vector<1x512xf32>
    %30 = vector.broadcast %29 : vector<1x512xf32> to vector<4x512xf32>
    %31 = arith.mulf %28, %30 : vector<4x512xf32>
    %c0_15 = arith.constant 0 : index
    %c0_16 = arith.constant 0 : index
    %32 = vector.load %arg12[%c0_15, %c0_16] : memref<36x512xf32, #tpu.memory_space<vmem>>, vector<4x512xf32>
    tpu.vector_store %arg12[%c0_15, %c0_16], %31 {strides = array<i32>} : memref<36x512xf32, #tpu.memory_space<vmem>>, vector<4x512xf32>,
    %c16_i32 = arith.constant 16 : i32
    %33 = tpu.dynamic_rotate %27 by %c16_i32 dim 1 : vector<4x512xf32>, i32 -> vector<4x512xf32>
    %c1 = arith.constant 1 : index
    %c0_17 = arith.constant 0 : index
    %34 = vector.load %arg10[%c1, %c0_17] : memref<9x512xf32, #tpu.memory_space<vmem>>, vector<1x512xf32>
    %35 = vector.broadcast %34 : vector<1x512xf32> to vector<4x512xf32>
    %36 = arith.mulf %33, %35 : vector<4x512xf32>
    %c4 = arith.constant 4 : index
    %c0_18 = arith.constant 0 : index
    %37 = vector.load %arg12[%c4, %c0_18] : memref<36x512xf32, #tpu.memory_space<vmem>>, vector<4x512xf32>
    tpu.vector_store %arg12[%c4, %c0_18], %36 {strides = array<i32>} : memref<36x512xf32, #tpu.memory_space<vmem>>, vector<4x512xf32>,
    %c15_i32 = arith.constant 15 : i32
    %38 = tpu.dynamic_rotate %27 by %c15_i32 dim 1 : vector<4x512xf32>, i32 -> vector<4x512xf32>
    %c2 = arith.constant 2 : index
    %c0_19 = arith.constant 0 : index
    %39 = vector.load %arg10[%c2, %c0_19] : memref<9x512xf32, #tpu.memory_space<vmem>>, vector<1x512xf32>
    %40 = vector.broadcast %39 : vector<1x512xf32> to vector<4x512xf32>
    %41 = arith.mulf %38, %40 : vector<4x512xf32>
    %c8 = arith.constant 8 : index
    %c0_20 = arith.constant 0 : index
    %42 = vector.load %arg12[%c8, %c0_20] : memref<36x512xf32, #tpu.memory_space<vmem>>, vector<4x512xf32>
    tpu.vector_store %arg12[%c8, %c0_20], %41 {strides = array<i32>} : memref<36x512xf32, #tpu.memory_space<vmem>>, vector<4x512xf32>,
    %c1_i32 = arith.constant 1 : i32
    %43 = tpu.dynamic_rotate %27 by %c1_i32 dim 1 : vector<4x512xf32>, i32 -> vector<4x512xf32>
    %c3 = arith.constant 3 : index
    %c0_21 = arith.constant 0 : index
    %44 = vector.load %arg10[%c3, %c0_21] : memref<9x512xf32, #tpu.memory_space<vmem>>, vector<1x512xf32>
    %45 = vector.broadcast %44 : vector<1x512xf32> to vector<4x512xf32>
    %46 = arith.mulf %43, %45 : vector<4x512xf32>
    %c12 = arith.constant 12 : index
    %c0_22 = arith.constant 0 : index
    %47 = vector.load %arg12[%c12, %c0_22] : memref<36x512xf32, #tpu.memory_space<vmem>>, vector<4x512xf32>
    tpu.vector_store %arg12[%c12, %c0_22], %46 {strides = array<i32>} : memref<36x512xf32, #tpu.memory_space<vmem>>, vector<4x512xf32>,
    %c16 = arith.constant 16 : index
    %c0_23 = arith.constant 0 : index
    %48 = vector.load %arg12[%c16, %c0_23] : memref<36x512xf32, #tpu.memory_space<vmem>>, vector<4x512xf32>
    tpu.vector_store %arg12[%c16, %c0_23], %27 {strides = array<i32>} : memref<36x512xf32, #tpu.memory_space<vmem>>, vector<4x512xf32>,
    %c511_i32 = arith.constant 511 : i32
    %49 = tpu.dynamic_rotate %27 by %c511_i32 dim 1 : vector<4x512xf32>, i32 -> vector<4x512xf32>
    %c5 = arith.constant 5 : index
    %c0_24 = arith.constant 0 : index
    %50 = vector.load %arg10[%c5, %c0_24] : memref<9x512xf32, #tpu.memory_space<vmem>>, vector<1x512xf32>
    %51 = vector.broadcast %50 : vector<1x512xf32> to vector<4x512xf32>
    %52 = arith.mulf %49, %51 : vector<4x512xf32>
    %c20 = arith.constant 20 : index
    %c0_25 = arith.constant 0 : index
    %53 = vector.load %arg12[%c20, %c0_25] : memref<36x512xf32, #tpu.memory_space<vmem>>, vector<4x512xf32>
    tpu.vector_store %arg12[%c20, %c0_25], %52 {strides = array<i32>} : memref<36x512xf32, #tpu.memory_space<vmem>>, vector<4x512xf32>,
    %c497_i32 = arith.constant 497 : i32
    %54 = tpu.dynamic_rotate %27 by %c497_i32 dim 1 : vector<4x512xf32>, i32 -> vector<4x512xf32>
    %c6 = arith.constant 6 : index
    %c0_26 = arith.constant 0 : index
    %55 = vector.load %arg10[%c6, %c0_26] : memref<9x512xf32, #tpu.memory_space<vmem>>, vector<1x512xf32>
    %56 = vector.broadcast %55 : vector<1x512xf32> to vector<4x512xf32>
    %57 = arith.mulf %54, %56 : vector<4x512xf32>
    %c24 = arith.constant 24 : index
    %c0_27 = arith.constant 0 : index
    %58 = vector.load %arg12[%c24, %c0_27] : memref<36x512xf32, #tpu.memory_space<vmem>>, vector<4x512xf32>
    tpu.vector_store %arg12[%c24, %c0_27], %57 {strides = array<i32>} : memref<36x512xf32, #tpu.memory_space<vmem>>, vector<4x512xf32>,
    %c496_i32 = arith.constant 496 : i32
    %59 = tpu.dynamic_rotate %27 by %c496_i32 dim 1 : vector<4x512xf32>, i32 -> vector<4x512xf32>
    %c7 = arith.constant 7 : index
    %c0_28 = arith.constant 0 : index
    %60 = vector.load %arg10[%c7, %c0_28] : memref<9x512xf32, #tpu.memory_space<vmem>>, vector<1x512xf32>
    %61 = vector.broadcast %60 : vector<1x512xf32> to vector<4x512xf32>
    %62 = arith.mulf %59, %61 : vector<4x512xf32>
    %c28 = arith.constant 28 : index
    %c0_29 = arith.constant 0 : index
    %63 = vector.load %arg12[%c28, %c0_29] : memref<36x512xf32, #tpu.memory_space<vmem>>, vector<4x512xf32>
    tpu.vector_store %arg12[%c28, %c0_29], %62 {strides = array<i32>} : memref<36x512xf32, #tpu.memory_space<vmem>>, vector<4x512xf32>,
    %c495_i32 = arith.constant 495 : i32
    %64 = tpu.dynamic_rotate %27 by %c495_i32 dim 1 : vector<4x512xf32>, i32 -> vector<4x512xf32>
    %c8_30 = arith.constant 8 : index
    %c0_31 = arith.constant 0 : index
    %65 = vector.load %arg10[%c8_30, %c0_31] : memref<9x512xf32, #tpu.memory_space<vmem>>, vector<1x512xf32>
    %66 = vector.broadcast %65 : vector<1x512xf32> to vector<4x512xf32>
    %67 = arith.mulf %64, %66 : vector<4x512xf32>
    %c32 = arith.constant 32 : index
    %c0_32 = arith.constant 0 : index
    %68 = vector.load %arg12[%c32, %c0_32] : memref<36x512xf32, #tpu.memory_space<vmem>>, vector<4x512xf32>
    tpu.vector_store %arg12[%c32, %c0_32], %67 {strides = array<i32>} : memref<36x512xf32, #tpu.memory_space<vmem>>, vector<4x512xf32>,
    %c0_33 = arith.constant 0 : index
    %c0_34 = arith.constant 0 : index
    %69 = vector.load %arg4[%c0_33, %c0_34] : memref<4x36xf32, #tpu.memory_space<vmem>>, vector<4x36xf32>
    %c0_35 = arith.constant 0 : index
    %c0_36 = arith.constant 0 : index
    %70 = vector.load %arg12[%c0_35, %c0_36] : memref<36x512xf32, #tpu.memory_space<vmem>>, vector<36x512xf32>
    %cst_37 = arith.constant dense<0.000000e+00> : vector<4x512xf32>
    %71 = tpu.matmul %69, %70, %cst_37 {dimension_numbers = #tpu.dot_dimension_numbers<[1], [0], [0], [1], [0, 0, 1, 1], [], []>} : vector<4x36xf32>, vector<36x512xf32>, vector<4x512xf32> -> vector<4x512xf32>
    %cst_38 = arith.constant dense<0.000000e+00> : vector<4xf32>
    %72 = vector.multi_reduction <add>, %71, %cst_38 [1] : vector<4x512xf32> to vector<4xf32>
    %73 = vector.shape_cast %72 : vector<4xf32> to vector<4x1xf32>
    %cst_39 = arith.constant 5.120000e+02 : f32
    %74 = vector.broadcast %cst_39 : f32 to vector<4x1xf32>
    %75 = arith.divf %73, %74 : vector<4x1xf32>
    %76 = vector.broadcast %75 : vector<4x1xf32> to vector<4x512xf32>
    %77 = arith.subf %71, %76 : vector<4x512xf32>
    %78 = arith.mulf %77, %77 : vector<4x512xf32>
    %cst_40 = arith.constant dense<0.000000e+00> : vector<4xf32>
    %79 = vector.multi_reduction <add>, %78, %cst_40 [1] : vector<4x512xf32> to vector<4xf32>
    %80 = vector.shape_cast %79 : vector<4xf32> to vector<4x1xf32>
    %cst_41 = arith.constant 5.120000e+02 : f32
    %81 = vector.broadcast %cst_41 : f32 to vector<4x1xf32>
    %82 = arith.divf %80, %81 : vector<4x1xf32>
    %c0_42 = arith.constant 0 : index
    %c0_43 = arith.constant 0 : index
    %83 = vector.load %arg5[%c0_42, %c0_43] : memref<4x1xf32, #tpu.memory_space<vmem>>, vector<4x1xf32>
    %cst_44 = arith.constant 9.99999974E-6 : f32
    %84 = vector.broadcast %cst_44 : f32 to vector<4x1xf32>
    %85 = arith.addf %82, %84 : vector<4x1xf32>
    %86 = math.rsqrt %85 : vector<4x1xf32>
    %87 = arith.mulf %83, %86 : vector<4x1xf32>
    %88 = vector.broadcast %87 : vector<4x1xf32> to vector<4x512xf32>
    %89 = arith.mulf %71, %88 : vector<4x512xf32>
    %c0_45 = arith.constant 0 : index
    %c0_46 = arith.constant 0 : index
    %90 = vector.load %arg6[%c0_45, %c0_46] : memref<4x1xf32, #tpu.memory_space<vmem>>, vector<4x1xf32>
    %91 = arith.mulf %75, %87 : vector<4x1xf32>
    %92 = arith.subf %90, %91 : vector<4x1xf32>
    %93 = vector.broadcast %92 : vector<4x1xf32> to vector<4x512xf32>
    %94 = arith.addf %89, %93 : vector<4x512xf32>
    %cst_47 = arith.constant 0.000000e+00 : f32
    %95 = vector.broadcast %cst_47 : f32 to vector<4x512xf32>
    %96 = arith.maximumf %94, %95 : vector<4x512xf32>
    %c0_48 = arith.constant 0 : index
    %c0_49 = arith.constant 0 : index
    %97 = vector.load %arg7[%c0_48, %c0_49] : memref<16x4xf32, #tpu.memory_space<vmem>>, vector<16x4xf32>
    %cst_50 = arith.constant dense<0.000000e+00> : vector<16x512xf32>
    %98 = tpu.matmul %97, %96, %cst_50 {dimension_numbers = #tpu.dot_dimension_numbers<[1], [0], [0], [1], [0, 0, 1, 1], [], []>} : vector<16x4xf32>, vector<4x512xf32>, vector<16x512xf32> -> vector<16x512xf32>
    %cst_51 = arith.constant dense<0.000000e+00> : vector<16xf32>
    %99 = vector.multi_reduction <add>, %98, %cst_51 [1] : vector<16x512xf32> to vector<16xf32>
    %100 = vector.shape_cast %99 : vector<16xf32> to vector<16x1xf32>
    %cst_52 = arith.constant 5.120000e+02 : f32
    %101 = vector.broadcast %cst_52 : f32 to vector<16x1xf32>
    %102 = arith.divf %100, %101 : vector<16x1xf32>
    %103 = vector.broadcast %102 : vector<16x1xf32> to vector<16x512xf32>
    %104 = arith.subf %98, %103 : vector<16x512xf32>
    %105 = arith.mulf %104, %104 : vector<16x512xf32>
    %cst_53 = arith.constant dense<0.000000e+00> : vector<16xf32>
    %106 = vector.multi_reduction <add>, %105, %cst_53 [1] : vector<16x512xf32> to vector<16xf32>
    %107 = vector.shape_cast %106 : vector<16xf32> to vector<16x1xf32>
    %cst_54 = arith.constant 5.120000e+02 : f32
    %108 = vector.broadcast %cst_54 : f32 to vector<16x1xf32>
    %109 = arith.divf %107, %108 : vector<16x1xf32>
    %c0_55 = arith.constant 0 : index
    %c0_56 = arith.constant 0 : index
    %110 = vector.load %arg8[%c0_55, %c0_56] : memref<16x1xf32, #tpu.memory_space<vmem>>, vector<16x1xf32>
    %cst_57 = arith.constant 9.99999974E-6 : f32
    %111 = vector.broadcast %cst_57 : f32 to vector<16x1xf32>
    %112 = arith.addf %109, %111 : vector<16x1xf32>
    %113 = math.rsqrt %112 : vector<16x1xf32>
    %114 = arith.mulf %110, %113 : vector<16x1xf32>
    %115 = vector.broadcast %114 : vector<16x1xf32> to vector<16x512xf32>
    %116 = arith.mulf %98, %115 : vector<16x512xf32>
    %c0_58 = arith.constant 0 : index
    %c0_59 = arith.constant 0 : index
    %117 = vector.load %arg9[%c0_58, %c0_59] : memref<16x1xf32, #tpu.memory_space<vmem>>, vector<16x1xf32>
    %118 = arith.mulf %102, %114 : vector<16x1xf32>
    %119 = arith.subf %117, %118 : vector<16x1xf32>
    %120 = vector.broadcast %119 : vector<16x1xf32> to vector<16x512xf32>
    %121 = arith.addf %116, %120 : vector<16x512xf32>
    %122 = arith.addf %121, %0 : vector<16x512xf32>
    %cst_60 = arith.constant 0.000000e+00 : f32
    %123 = vector.broadcast %cst_60 : f32 to vector<16x512xf32>
    %124 = arith.maximumf %122, %123 : vector<16x512xf32>
    %c0_61 = arith.constant 0 : index
    %c0_62 = arith.constant 0 : index
    %125 = vector.load %arg11[%c0_61, %c0_62] : memref<16x512xf32, #tpu.memory_space<vmem>>, vector<16x512xf32>
    tpu.vector_store %arg11[%c0_61, %c0_62], %124 {strides = array<i32>} : memref<16x512xf32, #tpu.memory_space<vmem>>, vector<16x512xf32>,
    return
  }
}

</mosaic_0001>

<bundles_post_ra>
// kernel: bottleneck_forward.1
= control target key start
LH: loop header
LB: loop body
LE: loop exit
PB: predicated region body
PF: predicated region fallthrough
CT: control target
= control target key end

     0   :  { %v1261_v3 = vmov 0.0   ;;  %vm47_vm0 = vcmask 130048   ;;  %vm193_vm1 = vcmask 1043456   ;;  %v1262_v42 = vmov 0   ;;  %s1265_s19 = smov 17   ;;  %s1266_s20 = smov 15   ;;  %s1689_s0 = inlined_call_operand.vmem [shape: f32[16,512], index: 0, kind: input, shape index: {}]   ;;  %s1690_s1 = inlined_call_operand.vmem [shape: f32[4,16], index: 1, kind: input, shape index: {}]   ;;  %s1691_s2 = inlined_call_operand.vmem [shape: f32[4,1], index: 2, kind: input, shape index: {}]   ;;  %s1692_s3 = inlined_call_operand.vmem [shape: f32[4,1], index: 3, kind: input, shape index: {}]   ;;  %s1693_s10 = inlined_call_operand.vmem [shape: f32[9,512], index: 10, kind: input, shape index: {}]   ;;  %s1694_s4 = inlined_call_operand.vmem [shape: f32[4,36], index: 4, kind: input, shape index: {}]   ;;  %s1695_s5 = inlined_call_operand.vmem [shape: f32[4,1], index: 5, kind: input, shape index: {}]   ;;  %s1696_s6 = inlined_call_operand.vmem [shape: f32[4,1], index: 6, kind: input, shape index: {}]   ;;  %s1697_s7 = inlined_call_operand.vmem [shape: f32[16,4], index: 7, kind: input, shape index: {}]   ;;  %s1698_s8 = inlined_call_operand.vmem [shape: f32[16,1], index: 8, kind: input, shape index: {}]   ;;  %s1699_s9 = inlined_call_operand.vmem [shape: f32[16,1], index: 9, kind: input, shape index: {}]   ;;  %s1700_s11 = inlined_call_operand.vmem [shape: f32[16,512], index: 11, kind: output, shape index: {}]  }
   0x1   :  { %v39_v0 = vld [vmem:[%s1689_s0 + $0x8] sm:$0xff]  ;;  %v38_v2 = vld [vmem:[%s1689_s0] sm:$0xff]  ;;  %115 = vmatprep.mubr.f32.mxu0 %v1261_v3  ;;  %186 = vmatprep.mubr.f32.mxu1 %v1261_v3  ;;  %v41_v6 = vld [vmem:[%s1689_s0 + $0x18] sm:$0xff]  ;;  %s1267_s21 = smov 127   ;;  %s1268_s22 = smov 112   ;;  %vm678_vm10 = vcmask 293888  }
   0x2   :  { %v43_v1 = vld [vmem:[%s1689_s0 + $0x28] sm:$0xff]  ;;  %v42_v5 = vld [vmem:[%s1689_s0 + $0x20] sm:$0xff]  ;;  %v45_v7 = vld [vmem:[%s1689_s0 + $0x38] sm:$0xff]  ;;  %1243 = vset.pattern.permute.xlu1 %v1262_v42  ;;  %1244 = vset.pattern.permute.xlu0 %v1262_v42  ;;  %s1269_s23 = smov 113   ;;  %s1270_s24 = smov 111   ;;  %vm895_vm11 = vcmask 31744  }
   0x3   :  { %v1209_v4 = vpack.c.bf16 %v43_v1, %v39_v0  ;;  %v1211_v8 = vpack.c.bf16 %v42_v5, %v38_v2  ;;  %v1213_v9 = vpack.c.bf16 %v45_v7, %v41_v6  ;;  %v40_v10 = vld [vmem:[%s1689_s0 + $0x10] sm:$0xff]  ;;  %v46_v13 = vld [vmem:[%s1690_s1] sm:$0xf]  ;;  %v260_v2 = vlaneseq }
   0x4   :  { %v44_v11 = vld [vmem:[%s1689_s0 + $0x30] sm:$0xff]  ;;  %v223_v46 = vld [vmem:[%s1691_s2] sm:$0xf]  ;;  %s1263_s2 = smov 16  }
   0x5   :  { %1210 = vmatprep.subr.bf16.mxu0 %v1209_v4  ;;  %v1215_v12 = vpack.c.bf16 %v44_v11, %v40_v10  ;;  %1214 = vmatprep.subr.bf16.mxu1 %v1213_v9  ;;  %v236_v49 = vld [vmem:[%s1692_s3] sm:$0xf]  ;;  %s1264_s3 = smov 1   ;;  %v270_v4 = vshrl.u32 %v260_v2, 7  ;;  %v1376_v5 = vand.u32 127, %v260_v2 }
   0x6   :  { %1212 = vmatpush1.bf16.msra.mxu0 %v1211_v8  ;;  %v1188_v7 = vld [vmem:[%s1693_s10 + $0x1] ss:$8 sm:$0xf] }
   0x7   :  { %1216 = vmatpush1.bf16.msra.mxu1 %v1215_v12  ;;  %v1378_v6 = vsub.s32 1, %v270_v4  ;;  %vm305_vm2 = vcmp.lt.s32.totalorder %v1376_v5, 16  ;;  %vm405_vm3 = vcmp.lt.s32.totalorder %v1376_v5, 1  ;;  %vm262_vm4 = vcmp.lt.s32.totalorder %v1376_v5, 17 }
   0x8   :  { %vm361_vm5 = vcmp.lt.s32.totalorder %v1376_v5, 15  ;;  %vm465_vm6 = vcmp.lt.s32.totalorder %v1376_v5, 127  ;;  %vm565_vm7 = vcmp.lt.s32.totalorder %v1376_v5, 112  ;;  %vm521_vm8 = vcmp.lt.s32.totalorder %v1376_v5, 113 }
   0x9   :  { %1186 = vmatmul.mubr.msk.f32.vlgmr.msra.gmra.mrb[0].mxu0 %vm47_vm0, %v46_v13  ;;  %v320_v8 = vrot.slane %v1188_v7, %v1378_v6  ;;  %vm621_vm9 = vcmp.lt.s32.totalorder %v1376_v5, 111  ;;  %v657_v5 = vld [vmem:[%s1694_s4] sm:$0xf] }
   0xa   :  { %1187 = vmatmul.mubr.msk.f32.vlgmr.msra.gmra.mrb[0].mxu1 %vm47_vm0, %v46_v13  ;;  %758 = vmatprep.mubr.f32.mxu0 %v1261_v3  ;;  %v1190_v13 = vld [vmem:[%s1693_s10 + $0x3] ss:$8 sm:$0xf] }
   0xb   :  { %829 = vmatprep.mubr.f32.mxu1 %v1261_v3 }
  0xdc   :  { %v117_v14 = vpop.f32.mrb[0].mxu0 }
  0xdd   :  { %v194_v15 = vsel %vm193_vm1, %v117_v14, 0.0  ;;  %v119_v16 = vpop.f32.mrb[1].mxu0  ;;  %v188_v17 = vpop.f32.mrb[0].mxu1 }
  0xde   :  { %v195_v18 = vsel %vm193_vm1, %v119_v16, 0.0  ;;  %v190_v19 = vpop.f32.mrb[1].mxu1  ;;  %v197_v20 = vsel %vm193_vm1, %v188_v17, 0.0 }
  0xdf   :  { %v196_v21 = vadd.f32 %v195_v18, %v194_v15  ;;  %v199_v23 = vsel %vm193_vm1, %v190_v19, 0.0  ;;  %v1394_v18 = vsub.s32 0, %v270_v4 }
  0xe1   :  { %v198_v22 = vadd.f32 %v197_v20, %v196_v21  ;;  %v1398_v20 = vsub.s32 3, %v270_v4 }
  0xe3   :  { %v200_v24 = vadd.f32 %v199_v23, %v198_v22 }
  0xe5   :  { %201 = vadd.xlane.f32.xlu0 %v200_v24 }
 0x172   :  { %v202_v25 = vpop.xlane.xlu0 %201 }
 0x173   :  { %v204_v26 = vmul.f32 0.001953125, %v202_v25  ;;  %v316_v25 = vrot.slane %v1188_v7, %v1394_v18 }
 0x175   :  { %v205_v27 = vsub.f32 %v117_v14, %v204_v26  ;;  %v206_v28 = vsub.f32 %v119_v16, %v204_v26  ;;  %v207_v29 = vsub.f32 %v188_v17, %v204_v26  ;;  %v208_v30 = vsub.f32 %v190_v19, %v204_v26 }
 0x177   :  { %v209_v31 = vmul.f32 %v205_v27, %v205_v27  ;;  %v210_v32 = vmul.f32 %v206_v28, %v206_v28  ;;  %v211_v33 = vmul.f32 %v207_v29, %v207_v29  ;;  %v212_v34 = vmul.f32 %v208_v30, %v208_v30 }
 0x178   :  { %v328_v27 = vrot.slane %v1188_v7, %v1398_v20 }
 0x179   :  { %v213_v35 = vsel %vm193_vm1, %v209_v31, 0.0  ;;  %v214_v36 = vsel %vm193_vm1, %v210_v32, 0.0  ;;  %v216_v38 = vsel %vm193_vm1, %v211_v33, 0.0  ;;  %v218_v40 = vsel %vm193_vm1, %v212_v34, 0.0 }
 0x17a   :  { %v215_v37 = vadd.f32 %v214_v36, %v213_v35  ;;  %v416_v31 = vrot.slane %v1190_v13, %v1394_v18 }
 0x17c   :  { %v217_v39 = vadd.f32 %v216_v38, %v215_v37 }
 0x17e   :  { %v219_v41 = vadd.f32 %v218_v40, %v217_v39  ;;  %v428_v39 = vrot.slane %v1190_v13, %v1398_v20  ;;  %v1417_v40 = vld [vmem:[%s1693_s10] ss:$8 sm:$0xf] }
 0x17f   :  { %v272_v2 = vrot.slane %v1417_v40, %v1394_v18 }
 0x180   :  { %220 = vadd.xlane.f32.xlu0 %v219_v41 }
 0x20d   :  { %v221_v43 = vpop.xlane.xlu0 %220 }
 0x20e   :  { %v222_v44 = vmul.f32 0.001953125, %v221_v43 }
 0x210   :  { %v224_v45 = vadd.f32 1e-05, %v222_v44 }
 0x212   :  { %1245 = vrsqrt.f32 %v224_v45 }
 0x21c   :  { %v1246_v47 = vpop.eup %1245 }
 0x21d   :  { %v226_v48 = vmul.f32 %v1246_v47, %v223_v46 }
 0x21f   :  { %229 = vperm.xlu1 %1243, %v226_v48   ;;  %v237_v50 = vmul.f32 %v226_v48, %v204_v26 }
 0x221   :  { %v238_v51 = vsub.f32 %v236_v49, %v237_v50 }
 0x223   :  { %241 = vperm.xlu1 %1243, %v238_v51  }
 0x29e   :  { %v230_v52 = vpop.permute.xlu1 %229 }
 0x29f   :  { %v232_v53 = vmul.f32 %v230_v52, %v117_v14  ;;  %v233_v54 = vmul.f32 %v230_v52, %v119_v16  ;;  %v234_v55 = vmul.f32 %v230_v52, %v188_v17  ;;  %v235_v56 = vmul.f32 %v230_v52, %v190_v19 }
 0x2a0   :  { %v420_v17 = vrot.slane %v1190_v13, %v1378_v6  ;;  %v1396_v19 = vsub.s32 2, %v270_v4  ;;  %v276_v52 = vrot.slane %v1417_v40, %v1378_v6 }
 0x2a2   :  { %v242_v57 = vpop.permute.xlu1 %241  ;;  %v324_v26 = vrot.slane %v1188_v7, %v1396_v19  ;;  %v424_v35 = vrot.slane %v1190_v13, %v1396_v19 }
 0x2a3   :  { %v244_v58 = vadd.f32 %v242_v57, %v232_v53  ;;  %v245_v59 = vadd.f32 %v242_v57, %v233_v54  ;;  %v246_v60 = vadd.f32 %v242_v57, %v234_v55  ;;  %v247_v61 = vadd.f32 %v242_v57, %v235_v56  ;;  %v1189_v53 = vld [vmem:[%s1693_s10 + $0x2] ss:$8 sm:$0xf] }
 0x2a4   :  { %v380_v4 = vrot.slane %v1189_v53, %v1396_v19  ;;  %v372_v13 = vrot.slane %v1189_v53, %v1394_v18 }
 0x2a5   :  { %v248_v62 = vmax.f32 %v244_v58, 0.0  ;;  %v249_v63 = vmax.f32 %v245_v59, 0.0  ;;  %v250_v0 = vmax.f32 %v246_v60, 0.0  ;;  %v251_v1 = vmax.f32 %v247_v61, 0.0 }
 0x2a6   :  { %v376_v61 = vrot.slane %v1189_v53, %v1378_v6 }
 0x2a7   :  { %453 = vst [vmem:[#allocation2 + $0x40] sm:$0xf] %v248_v62  ;;  %454 = vst [vmem:[#allocation2 + $0x48] sm:$0xf] %v249_v63  ;;  %299 = vrot.lane.b32.xlu1 %v249_v63, %s1263_s2  ;;  %297 = vrot.lane.b32.xlu0 %v248_v62, %s1263_s2 }
 0x2a8   :  { %455 = vst [vmem:[#allocation2 + $0x50] sm:$0xf] %v250_v0  ;;  %456 = vst [vmem:[#allocation2 + $0x58] sm:$0xf] %v251_v1 }
 0x2ab   :  { %397 = vrot.lane.b32.xlu1 %v248_v62, %s1264_s3  ;;  %254 = vrot.lane.b32.xlu0 %v249_v63, %s1265_s19 }
 0x2af   :  { %399 = vrot.lane.b32.xlu1 %v249_v63, %s1264_s3  ;;  %355 = vrot.lane.b32.xlu0 %v249_v63, %s1266_s20 }
 0x2b3   :  { %303 = vrot.lane.b32.xlu1 %v251_v1, %s1263_s2  ;;  %301 = vrot.lane.b32.xlu0 %v250_v0, %s1263_s2 }
 0x2b7   :  { %403 = vrot.lane.b32.xlu1 %v251_v1, %s1264_s3  ;;  %401 = vrot.lane.b32.xlu0 %v250_v0, %s1264_s3 }
 0x2bb   :  { %252 = vrot.lane.b32.xlu1 %v248_v62, %s1265_s19  ;;  %461 = vrot.lane.b32.xlu0 %v250_v0, %s1267_s21 }
 0x2bf   :  { %353 = vrot.lane.b32.xlu1 %v248_v62, %s1266_s20  ;;  %561 = vrot.lane.b32.xlu0 %v250_v0, %s1268_s22 }
 0x2c3   :  { %258 = vrot.lane.b32.xlu1 %v251_v1, %s1265_s19  ;;  %357 = vrot.lane.b32.xlu0 %v250_v0, %s1266_s20 }
 0x2c7   :  { %359 = vrot.lane.b32.xlu1 %v251_v1, %s1266_s20  ;;  %557 = vrot.lane.b32.xlu0 %v248_v62, %s1268_s22 }
 0x2cb   :  { %459 = vrot.lane.b32.xlu1 %v249_v63, %s1267_s21  ;;  %517 = vrot.lane.b32.xlu0 %v250_v0, %s1269_s23 }
 0x2cf   :  { %559 = vrot.lane.b32.xlu1 %v249_v63, %s1268_s22  ;;  %513 = vrot.lane.b32.xlu0 %v248_v62, %s1269_s23 }
 0x2d3   :  { %256 = vrot.lane.b32.xlu1 %v250_v0, %s1265_s19  ;;  %519 = vrot.lane.b32.xlu0 %v251_v1, %s1269_s23 }
 0x2d7   :  { %457 = vrot.lane.b32.xlu1 %v248_v62, %s1267_s21  ;;  %617 = vrot.lane.b32.xlu0 %v250_v0, %s1270_s24 }
 0x2db   :  { %515 = vrot.lane.b32.xlu1 %v249_v63, %s1269_s23  ;;  %619 = vrot.lane.b32.xlu0 %v251_v1, %s1270_s24 }
 0x2df   :  { %463 = vrot.lane.b32.xlu1 %v251_v1, %s1267_s21 }
 0x2e3   :  { %563 = vrot.lane.b32.xlu1 %v251_v1, %s1268_s22 }
 0x2e7   :  { %615 = vrot.lane.b32.xlu1 %v249_v63, %s1270_s24 }
 0x2eb   :  { %613 = vrot.lane.b32.xlu1 %v248_v62, %s1270_s24 }
 0x319   :  { %v300_v9 = vpop.permute.xlu1 %299  ;;  %v298_v10 = vpop.permute.xlu0 %297 }
 0x31a   :  { %v308_v11 = vsel %vm305_vm2, %v298_v10, %v300_v9 }
 0x31b   :  { %v334_v12 = vmul.f32 %v320_v8, %v308_v11 }
 0x31d   :  { %v342_v14 = vrot.slane %v334_v12, 4  ;;  %v398_v15 = vpop.permute.xlu1 %397  ;;  %v1390_v16 = vpop.permute.xlu0 %254 }
 0x31f   :  { %350 = vst [vmem:[#allocation2 + $0x8] sm:$0xf0] %v342_v14  ;;  %v384_v14 = vrot.slane %v1189_v53, %v1398_v20 }
 0x321   :  { %v400_v21 = vpop.permute.xlu1 %399  ;;  %v356_v22 = vpop.permute.xlu0 %355 }
 0x322   :  { %v408_v23 = vsel %vm405_vm3, %v398_v15, %v400_v21 }
 0x323   :  { %v434_v24 = vmul.f32 %v420_v17, %v408_v23 }
 0x325   :  { %v442_v28 = vrot.slane %v434_v24, 4  ;;  %v304_v29 = vpop.permute.xlu1 %303  ;;  %v302_v30 = vpop.permute.xlu0 %301 }
 0x326   :  { %v309_v32 = vsel %vm305_vm2, %v304_v29, %v298_v10  ;;  %v306_v33 = vsel %vm305_vm2, %v302_v30, %v304_v29  ;;  %v307_v34 = vsel %vm305_vm2, %v300_v9, %v302_v30  ;;  %v1468_v29 = vld [vmem:[%s1693_s10 + $0x7] ss:$8 sm:$0xf] }
 0x327   :  { %450 = vst [vmem:[#allocation2 + $0x28] sm:$0xf0] %v442_v28  ;;  %v333_v36 = vmul.f32 %v316_v25, %v309_v32  ;;  %v335_v37 = vmul.f32 %v324_v26, %v307_v34  ;;  %v336_v38 = vmul.f32 %v328_v27, %v306_v33 }
 0x329   :  { %v341_v41 = vrot.slane %v333_v36, 4  ;;  %v343_v42 = vrot.slane %v335_v37, 4  ;;  %v344_v43 = vrot.slane %v336_v38, 4  ;;  %v404_v44 = vpop.permute.xlu1 %403  ;;  %v402_v45 = vpop.permute.xlu0 %401  ;;  %v580_v36 = vrot.slane %v1468_v29, %v1378_v6  ;;  %v1192_v37 = vld [vmem:[%s1693_s10 + $0x6] ss:$8 sm:$0xf] }
 0x32a   :  { %v409_v46 = vsel %vm405_vm3, %v404_v44, %v398_v15  ;;  %v406_v47 = vsel %vm405_vm3, %v402_v45, %v404_v44  ;;  %v407_v48 = vsel %vm405_vm3, %v400_v21, %v402_v45  ;;  %v1454_v15 = vld [vmem:[%s1693_s10 + $0x5] ss:$8 sm:$0xf]  ;;  %v284_v45 = vrot.slane %v1417_v40, %v1398_v20 }
 0x32b   :  { %349 = vst [vmem:[#allocation2] sm:$0xf0] %v341_v41  ;;  %351 = vst [vmem:[#allocation2 + $0x10] sm:$0xf0] %v343_v42  ;;  %v433_v49 = vmul.f32 %v416_v31, %v409_v46  ;;  %v435_v50 = vmul.f32 %v424_v35, %v407_v48  ;;  %v436_v51 = vmul.f32 %v428_v39, %v406_v47 }
 0x32c   :  { %352 = vst [vmem:[#allocation2 + $0x18] sm:$0xf0] %v344_v43  ;;  %v480_v26 = vrot.slane %v1454_v15, %v1378_v6  ;;  %v576_v35 = vrot.slane %v1468_v29, %v1394_v18  ;;  %v280_v42 = vrot.slane %v1417_v40, %v1396_v19  ;;  %v540_v48 = vrot.slane %v1192_v37, %v1396_v19 }
 0x32d   :  { %v441_v54 = vrot.slane %v433_v49, 4  ;;  %v443_v55 = vrot.slane %v435_v50, 4  ;;  %v444_v56 = vrot.slane %v436_v51, 4  ;;  %v253_v57 = vpop.permute.xlu1 %252  ;;  %v1431_v58 = vpop.permute.xlu0 %461  ;;  %v544_v49 = vrot.slane %v1192_v37, %v1398_v20 }
 0x32e   :  { %v265_v59 = vsel %vm262_vm4, %v253_v57, %v1390_v16 }
 0x32f   :  { %449 = vst [vmem:[#allocation2 + $0x20] sm:$0xf0] %v441_v54  ;;  %451 = vst [vmem:[#allocation2 + $0x30] sm:$0xf0] %v443_v55  ;;  %v290_v60 = vmul.f32 %v276_v52, %v265_v59 }
 0x330   :  { %452 = vst [vmem:[#allocation2 + $0x38] sm:$0xf0] %v444_v56 }
 0x331   :  { %294 = vst [vmem:[#allocation2 + $0x8] sm:$0xf] %v290_v60  ;;  %v354_v62 = vpop.permute.xlu1 %353  ;;  %v1438_v63 = vpop.permute.xlu0 %561 }
 0x332   :  { %v364_v0 = vsel %vm361_vm5, %v354_v62, %v356_v22 }
 0x333   :  { %v390_v1 = vmul.f32 %v376_v61, %v364_v0 }
 0x335   :  { %394 = vst [vmem:[#allocation2 + $0x28] sm:$0xf] %v390_v1  ;;  %v259_v7 = vpop.permute.xlu1 %258  ;;  %v358_v8 = vpop.permute.xlu0 %357 }
 0x336   :  { %v266_v9 = vsel %vm262_vm4, %v259_v7, %v253_v57  ;;  %v363_v10 = vsel %vm361_vm5, %v356_v22, %v358_v8  ;;  %v476_v57 = vrot.slane %v1454_v15, %v1394_v18 }
 0x337   :  { %v289_v11 = vmul.f32 %v272_v2, %v266_v9  ;;  %v391_v12 = vmul.f32 %v380_v4, %v363_v10  ;;  %v1508_v4 = vld [vmem:[%s1693_s10 + $0x20] ss:$8 sm:$0xf]  ;;  %v532_v9 = vrot.slane %v1192_v37, %v1394_v18 }
 0x338   :  { %v659_v27 = vld [vmem:[#allocation2 + $0x8] sm:$0xff] }
 0x339   :  { %293 = vst [vmem:[#allocation2] sm:$0xf] %v289_v11  ;;  %395 = vst [vmem:[#allocation2 + $0x30] sm:$0xf] %v391_v12  ;;  %v360_v17 = vpop.permute.xlu1 %359  ;;  %v1456_v21 = vpop.permute.xlu0 %557  ;;  %v536_v11 = vrot.slane %v1192_v37, %v1378_v6  ;;  %v640_v12 = vrot.slane %v1508_v4, %v1396_v19 }
 0x33a   :  { %v362_v23 = vsel %vm361_vm5, %v358_v8, %v360_v17  ;;  %v365_v22 = vsel %vm361_vm5, %v360_v17, %v354_v62 }
 0x33b   :  { %v389_v24 = vmul.f32 %v372_v13, %v365_v22  ;;  %v392_v25 = vmul.f32 %v384_v14, %v362_v23 }
 0x33c   :  { %v663_v28 = vld [vmem:[#allocation2 + $0x28] sm:$0xff] }
 0x33d   :  { %393 = vst [vmem:[#allocation2 + $0x20] sm:$0xf] %v389_v24  ;;  %396 = vst [vmem:[#allocation2 + $0x38] sm:$0xf] %v392_v25  ;;  %v460_v30 = vpop.permute.xlu1 %459  ;;  %v518_v31 = vpop.permute.xlu0 %517  ;;  %v1217_v32 = vpack.c.bf16 %v663_v28, %v659_v27  ;;  %v484_v25 = vrot.slane %v1454_v15, %v1396_v19 }
 0x33e   :  { %v467_v33 = vsel %vm465_vm6, %v460_v30, %v1431_v58 }
 0x33f   :  { %v494_v34 = vmul.f32 %v480_v26, %v467_v33  ;;  %1218 = vmatprep.subr.bf16.mxu0 %v1217_v32 }
 0x340   :  { %v658_v50 = vld [vmem:[#allocation2] sm:$0xff]  ;;  %v664_v32 = vld [vmem:[#allocation2 + $0x30] sm:$0xff] }
 0x341   :  { %v502_v38 = vrot.slane %v494_v34, 4  ;;  %v560_v39 = vpop.permute.xlu1 %559  ;;  %v514_v41 = vpop.permute.xlu0 %513 }
 0x342   :  { %v567_v43 = vsel %vm565_vm7, %v560_v39, %v1438_v63  ;;  %v568_v44 = vsel %vm565_vm7, %v1456_v21, %v560_v39 }
 0x343   :  { %510 = vst [vmem:[#allocation2 + $0x48] sm:$0xf0] %v502_v38  ;;  %v593_v46 = vmul.f32 %v576_v35, %v568_v44  ;;  %v594_v47 = vmul.f32 %v580_v36, %v567_v43  ;;  %v588_v43 = vrot.slane %v1468_v29, %v1398_v20 }
 0x344   :  { %v662_v51 = vld [vmem:[#allocation2 + $0x20] sm:$0xff]  ;;  %v665_v34 = vld [vmem:[#allocation2 + $0x38] sm:$0xff] }
 0x345   :  { %v601_v52 = vrot.slane %v593_v46, 4  ;;  %v602_v53 = vrot.slane %v594_v47, 4  ;;  %v257_v54 = vpop.permute.xlu1 %256  ;;  %v520_v55 = vpop.permute.xlu0 %519  ;;  %v1219_v56 = vpack.c.bf16 %v662_v51, %v658_v50 }
 0x346   :  { %v263_v40 = vsel %vm262_vm4, %v257_v54, %v259_v7  ;;  %v264_v59 = vsel %vm262_vm4, %v1390_v16, %v257_v54  ;;  %v522_v60 = vsel %vm521_vm8, %v518_v31, %v520_v55  ;;  %v525_v61 = vsel %vm521_vm8, %v520_v55, %v514_v41 }
 0x347   :  { %609 = vst [vmem:[#allocation2 + $0x60] sm:$0xf0] %v601_v52  ;;  %610 = vst [vmem:[#allocation2 + $0x68] sm:$0xf0] %v602_v53  ;;  %v291_v62 = vmul.f32 %v280_v42, %v264_v59  ;;  %v292_v0 = vmul.f32 %v284_v45, %v263_v40  ;;  %v551_v1 = vmul.f32 %v540_v48, %v522_v60  ;;  %1220 = vmatpush1.bf16.msra.mxu0 %v1219_v56 }
 0x348   :  { %v552_v2 = vmul.f32 %v544_v49, %v525_v61  ;;  %v632_v40 = vrot.slane %v1508_v4, %v1394_v18 }
 0x349   :  { %295 = vst [vmem:[#allocation2 + $0x10] sm:$0xf] %v291_v62  ;;  %296 = vst [vmem:[#allocation2 + $0x18] sm:$0xf] %v292_v0  ;;  %v458_v16 = vpop.permute.xlu1 %457  ;;  %v618_v7 = vpop.permute.xlu0 %617 }
 0x34a   :  { %555 = vst [vmem:[#allocation2 + $0x70] sm:$0xf] %v551_v1  ;;  %556 = vst [vmem:[#allocation2 + $0x78] sm:$0xf] %v552_v2  ;;  %v468_v8 = vsel %vm465_vm6, %v458_v16, %v460_v30  ;;  %v488_v30 = vrot.slane %v1454_v15, %v1398_v20  ;;  %v584_v15 = vrot.slane %v1468_v29, %v1396_v19  ;;  %v667_v29 = vld [vmem:[#allocation2 + $0x48] sm:$0xff] }
 0x34b   :  { %v493_v10 = vmul.f32 %v476_v57, %v468_v8  ;;  %v636_v19 = vrot.slane %v1508_v4, %v1378_v6  ;;  %v644_v6 = vrot.slane %v1508_v4, %v1398_v20 }
 0x34d   :  { %v501_v13 = vrot.slane %v493_v10, 4  ;;  %v516_v14 = vpop.permute.xlu1 %515  ;;  %v620_v17 = vpop.permute.xlu0 %619 }
 0x34e   :  { %v523_v23 = vsel %vm521_vm8, %v516_v14, %v518_v31  ;;  %v524_v22 = vsel %vm521_vm8, %v514_v41, %v516_v14  ;;  %v622_v24 = vsel %vm621_vm9, %v618_v7, %v620_v17 }
 0x34f   :  { %509 = vst [vmem:[#allocation2 + $0x40] sm:$0xf0] %v501_v13  ;;  %v549_v26 = vmul.f32 %v532_v9, %v524_v22  ;;  %v550_v27 = vmul.f32 %v536_v11, %v523_v23  ;;  %v651_v28 = vmul.f32 %v640_v12, %v622_v24 }
 0x350   :  { %v661_v33 = vld [vmem:[#allocation2 + $0x18] sm:$0xff]  ;;  %v660_v31 = vld [vmem:[#allocation2 + $0x10] sm:$0xff] }
 0x351   :  { %553 = vst [vmem:[#allocation2 + $0x60] sm:$0xf] %v549_v26  ;;  %554 = vst [vmem:[#allocation2 + $0x68] sm:$0xf] %v550_v27  ;;  %v464_v35 = vpop.permute.xlu1 %463  ;;  %v1225_v36 = vpack.c.bf16 %v665_v34, %v661_v33  ;;  %v1227_v37 = vpack.c.bf16 %v664_v32, %v660_v31 }
 0x352   :  { %655 = vst [vmem:[#allocation2 + $0x90] sm:$0xf] %v651_v28  ;;  %v466_v38 = vsel %vm465_vm6, %v1431_v58, %v464_v35  ;;  %v469_v39 = vsel %vm465_vm6, %v464_v35, %v458_v16 }
 0x353   :  { %v495_v41 = vmul.f32 %v484_v25, %v466_v38  ;;  %v496_v42 = vmul.f32 %v488_v30, %v469_v39  ;;  %1226 = vmatprep.subr.bf16.mxu1 %v1225_v36 }
 0x354   :  { %1228 = vmatpush1.bf16.msra.mxu1 %v1227_v37 }
 0x355   :  { %v503_v44 = vrot.slane %v495_v41, 4  ;;  %v504_v45 = vrot.slane %v496_v42, 4  ;;  %v564_v46 = vpop.permute.xlu1 %563 }
 0x356   :  { %v566_v58 = vsel %vm565_vm7, %v1438_v63, %v564_v46  ;;  %v569_v47 = vsel %vm565_vm7, %v564_v46, %v1456_v21  ;;  %v666_v51 = vld [vmem:[#allocation2 + $0x40] sm:$0xff] }
 0x357   :  { %511 = vst [vmem:[#allocation2 + $0x50] sm:$0xf0] %v503_v44  ;;  %512 = vst [vmem:[#allocation2 + $0x58] sm:$0xf0] %v504_v45  ;;  %v595_v48 = vmul.f32 %v584_v15, %v566_v58  ;;  %v596_v49 = vmul.f32 %v588_v43, %v569_v47 }
 0x358   :  { %v671_v50 = vld [vmem:[#allocation2 + $0x68] sm:$0xff]  ;;  %v670_v52 = vld [vmem:[#allocation2 + $0x60] sm:$0xff] }
 0x359   :  { %v603_v53 = vrot.slane %v595_v48, 4  ;;  %v604_v54 = vrot.slane %v596_v49, 4  ;;  %v616_v55 = vpop.permute.xlu1 %615  ;;  %v1221_v56 = vpack.c.bf16 %v671_v50, %v667_v29  ;;  %v1223_v63 = vpack.c.bf16 %v670_v52, %v666_v51  ;;  %v676_v10 = vld [vmem:[#allocation2 + $0x90] sm:$0xf]  ;;  %v864_v48 = vld [vmem:[%s1695_s5] sm:$0xf] }
 0x35a   :  { %v623_v57 = vsel %vm621_vm9, %v616_v55, %v618_v7  ;;  %v877_v29 = vld [vmem:[%s1696_s6] sm:$0xf] }
 0x35b   :  { %611 = vst [vmem:[#allocation2 + $0x70] sm:$0xf0] %v603_v53  ;;  %612 = vst [vmem:[#allocation2 + $0x78] sm:$0xf0] %v604_v54  ;;  %v650_v21 = vmul.f32 %v636_v19, %v623_v57  ;;  %1222 = vmatprep.subr.bf16.mxu0 %v1221_v56 }
 0x35c   :  { %1224 = vmatpush1.bf16.msra.mxu0 %v1223_v63 }
 0x35d   :  { %654 = vst [vmem:[#allocation2 + $0x88] sm:$0xf] %v650_v21  ;;  %v614_v59 = vpop.permute.xlu1 %613 }
 0x35e   :  { %v624_v60 = vsel %vm621_vm9, %v614_v59, %v616_v55  ;;  %v625_v61 = vsel %vm621_vm9, %v620_v17, %v614_v59  ;;  %v669_v1 = vld [vmem:[#allocation2 + $0x58] sm:$0xff]  ;;  %v668_v16 = vld [vmem:[#allocation2 + $0x50] sm:$0xff] }
 0x35f   :  { %v649_v62 = vmul.f32 %v632_v40, %v624_v60  ;;  %v652_v0 = vmul.f32 %v644_v6, %v625_v61 }
 0x361   :  { %653 = vst [vmem:[#allocation2 + $0x80] sm:$0xf] %v649_v62  ;;  %656 = vst [vmem:[#allocation2 + $0x98] sm:$0xf] %v652_v0  ;;  %v893_v0 = vld [vmem:[%s1697_s7] sm:$0xff] }
 0x362   :  { %v673_v2 = vld [vmem:[#allocation2 + $0x78] sm:$0xff]  ;;  %v672_v18 = vld [vmem:[#allocation2 + $0x70] sm:$0xff] }
 0x363   :  { %v1229_v7 = vpack.c.bf16 %v673_v2, %v669_v1  ;;  %v1231_v8 = vpack.c.bf16 %v672_v18, %v668_v16  ;;  %v894_v1 = vld [vmem:[%s1697_s7 + $0x8] sm:$0xff] }
 0x364   :  { %v675_v20 = vld [vmem:[#allocation2 + $0x88] sm:$0xf] }
 0x365   :  { %1195 = vmatprep.subr.msk.mxu0 %vm193_vm1, %v675_v20  ;;  %1230 = vmatprep.subr.bf16.mxu1 %v1229_v7 }
 0x366   :  { %1232 = vmatpush1.bf16.msra.mxu1 %v1231_v8 }
 0x368   :  { %v674_v4 = vld [vmem:[#allocation2 + $0x80] sm:$0xf]  ;;  %v677_v9 = vld [vmem:[#allocation2 + $0x98] sm:$0xf] }
 0x369   :  { %1196 = vmatpush1.msk.msra.mxu0 %vm193_vm1, %v674_v4  ;;  %1198 = vmatprep.subr.msk.mxu1 %vm193_vm1, %v677_v9 }
 0x36a   :  { %1197 = vmatmul.mubr.msk.f32.vlgmr.msra.gmra.mrb[2].mxu0 %vm678_vm10, %v657_v5  ;;  %1199 = vmatpush1.msk.msra.mxu1 %vm193_vm1, %v676_v10 }
 0x36b   :  { %1200 = vmatmul.mubr.msk.f32.vlgmr.msra.gmra.mrb[2].mxu1 %vm678_vm10, %v657_v5  ;;  %978 = vmatprep.mubr.f32.mxu0 %v1261_v3 }
 0x36c   :  { %1055 = vmatprep.mubr.f32.mxu1 %v1261_v3 }
 0x43d   :  { %v760_v11 = vpop.f32.mrb[2].mxu0 }
 0x43e   :  { %v836_v12 = vsel %vm193_vm1, %v760_v11, 0.0  ;;  %v762_v13 = vpop.f32.mrb[3].mxu0  ;;  %v831_v14 = vpop.f32.mrb[2].mxu1 }
 0x43f   :  { %v837_v17 = vsel %vm193_vm1, %v762_v13, 0.0  ;;  %v839_v23 = vsel %vm193_vm1, %v831_v14, 0.0  ;;  %v833_v22 = vpop.f32.mrb[3].mxu1 }
 0x440   :  { %v838_v24 = vadd.f32 %v837_v17, %v836_v12  ;;  %v841_v26 = vsel %vm193_vm1, %v833_v22, 0.0 }
 0x442   :  { %v840_v25 = vadd.f32 %v839_v23, %v838_v24 }
 0x444   :  { %v842_v27 = vadd.f32 %v841_v26, %v840_v25 }
 0x446   :  { %843 = vadd.xlane.f32.xlu1 %v842_v27 }
 0x4d3   :  { %v844_v28 = vpop.xlane.xlu1 %843 }
 0x4d4   :  { %v845_v30 = vmul.f32 0.001953125, %v844_v28 }
 0x4d6   :  { %v846_v32 = vsub.f32 %v760_v11, %v845_v30  ;;  %v847_v33 = vsub.f32 %v762_v13, %v845_v30  ;;  %v848_v34 = vsub.f32 %v831_v14, %v845_v30  ;;  %v849_v31 = vsub.f32 %v833_v22, %v845_v30 }
 0x4d8   :  { %v850_v35 = vmul.f32 %v846_v32, %v846_v32  ;;  %v851_v36 = vmul.f32 %v847_v33, %v847_v33  ;;  %v852_v37 = vmul.f32 %v848_v34, %v848_v34  ;;  %v853_v38 = vmul.f32 %v849_v31, %v849_v31 }
 0x4da   :  { %v854_v39 = vsel %vm193_vm1, %v850_v35, 0.0  ;;  %v855_v41 = vsel %vm193_vm1, %v851_v36, 0.0  ;;  %v857_v15 = vsel %vm193_vm1, %v852_v37, 0.0  ;;  %v859_v44 = vsel %vm193_vm1, %v853_v38, 0.0 }
 0x4db   :  { %v856_v42 = vadd.f32 %v855_v41, %v854_v39 }
 0x4dd   :  { %v858_v43 = vadd.f32 %v857_v15, %v856_v42 }
 0x4df   :  { %v860_v45 = vadd.f32 %v859_v44, %v858_v43 }
 0x4e1   :  { %861 = vadd.xlane.f32.xlu0 %v860_v45 }
 0x56e   :  { %v862_v46 = vpop.xlane.xlu0 %861 }
 0x56f   :  { %v863_v58 = vmul.f32 0.001953125, %v862_v46 }
 0x571   :  { %v865_v47 = vadd.f32 1e-05, %v863_v58 }
 0x573   :  { %1247 = vrsqrt.f32 %v865_v47 }
 0x57d   :  { %v1248_v49 = vpop.eup %1247 }
 0x57e   :  { %v867_v19 = vmul.f32 %v1248_v49, %v864_v48 }
 0x580   :  { %870 = vperm.xlu0 %1244, %v867_v19   ;;  %v878_v50 = vmul.f32 %v867_v19, %v845_v30 }
 0x582   :  { %v879_v51 = vsub.f32 %v877_v29, %v878_v50  ;;  %v1108_v50 = vld [vmem:[%s1698_s8] sm:$0xff] }
 0x584   :  { %882 = vperm.xlu1 %1243, %v879_v51  }
 0x5ff   :  { %v871_v52 = vpop.permute.xlu0 %870 }
 0x600   :  { %v873_v53 = vmul.f32 %v871_v52, %v760_v11  ;;  %v874_v54 = vmul.f32 %v871_v52, %v762_v13  ;;  %v875_v55 = vmul.f32 %v871_v52, %v831_v14  ;;  %v876_v56 = vmul.f32 %v871_v52, %v833_v22 }
 0x603   :  { %v883_v63 = vpop.permute.xlu1 %882 }
 0x604   :  { %v885_v57 = vadd.f32 %v883_v63, %v873_v53  ;;  %v886_v21 = vadd.f32 %v883_v63, %v874_v54  ;;  %v887_v40 = vadd.f32 %v883_v63, %v875_v55  ;;  %v888_v6 = vadd.f32 %v883_v63, %v876_v56  ;;  %v1134_v53 = vld [vmem:[%s1699_s9] sm:$0xff]  ;;  %v1109_v54 = vld [vmem:[%s1698_s8 + $0x8] sm:$0xff] }
 0x606   :  { %v889_v59 = vmax.f32 %v885_v57, 0.0  ;;  %v890_v60 = vmax.f32 %v886_v21, 0.0  ;;  %v891_v61 = vmax.f32 %v887_v40, 0.0  ;;  %v892_v62 = vmax.f32 %v888_v6, 0.0  ;;  %v1135_v21 = vld [vmem:[%s1699_s9 + $0x8] sm:$0xff] }
 0x608   :  { %1201 = vmatprep.subr.msk.mxu0 %vm193_vm1, %v890_v60  ;;  %1205 = vmatprep.subr.msk.mxu1 %vm193_vm1, %v892_v62 }
 0x609   :  { %1202 = vmatpush1.msk.msra.mxu0 %vm193_vm1, %v889_v59  ;;  %1206 = vmatpush1.msk.msra.mxu1 %vm193_vm1, %v891_v61 }
 0x60a   :  { %1203 = vmatmul.mubr.msk.f32.vlgmr.msra.gmra.mrb[4].mxu0 %vm895_vm11, %v893_v0  ;;  %1207 = vmatmul.mubr.msk.f32.vlgmr.msra.gmra.mrb[4].mxu1 %vm895_vm11, %v893_v0 }
 0x60b   :  { %984 = vmatprep.mubr.f32.mxu0 %v1261_v3  ;;  %1061 = vmatprep.mubr.f32.mxu1 %v1261_v3 }
 0x60e   :  { %1204 = vmatmul.mubr.msk.f32.gmra.mrb[6].mxu0 %vm895_vm11, %v894_v1  ;;  %1208 = vmatmul.mubr.msk.f32.gmra.mrb[6].mxu1 %vm895_vm11, %v894_v1 }
 0x6dd   :  { %v1589_v2 = vpop.f32.mrb[4].mxu0  ;;  %v1591_v16 = vpop.f32.mrb[4].mxu1 }
 0x6de   :  { %v1593_v18 = vpop.f32.mrb[5].mxu0  ;;  %v1595_v7 = vpop.f32.mrb[5].mxu1 }
 0x6df   :  { %v1068_v8 = vadd.f32 %v1593_v18, %v1589_v2 }
 0x6e1   :  { %v1599_v20 = vpop.f32.mrb[6].mxu0  ;;  %v1601_v5 = vpop.f32.mrb[6].mxu1  ;;  %v1069_v4 = vadd.f32 %v1068_v8, %v1591_v16 }
 0x6e2   :  { %v1604_v3 = vpop.f32.mrb[7].mxu0  ;;  %v1606_v9 = vpop.f32.mrb[7].mxu1 }
 0x6e3   :  { %v1073_v10 = vadd.f32 %v1604_v3, %v1599_v20  ;;  %v1070_v11 = vadd.f32 %v1069_v4, %v1595_v7 }
 0x6e5   :  { %1071 = vadd.xlane.f32.xlu1 %v1070_v11  ;;  %v1074_v12 = vadd.f32 %v1073_v10, %v1601_v5 }
 0x6e7   :  { %v1075_v13 = vadd.f32 %v1074_v12, %v1606_v9 }
 0x6e9   :  { %1076 = vadd.xlane.f32.xlu0 %v1075_v13 }
 0x772   :  { %v1072_v14 = vpop.xlane.xlu1 %1071 }
 0x773   :  { %v1078_v17 = vmul.f32 0.001953125, %v1072_v14 }
 0x775   :  { %v1080_v23 = vsub.f32 %v1589_v2, %v1078_v17  ;;  %v1081_v22 = vsub.f32 %v1593_v18, %v1078_v17  ;;  %v1082_v24 = vsub.f32 %v1591_v16, %v1078_v17  ;;  %v1083_v26 = vsub.f32 %v1595_v7, %v1078_v17 }
 0x776   :  { %v1077_v25 = vpop.xlane.xlu0 %1076 }
 0x777   :  { %v1079_v27 = vmul.f32 0.001953125, %v1077_v25  ;;  %v1088_v28 = vmul.f32 %v1080_v23, %v1080_v23  ;;  %v1089_v30 = vmul.f32 %v1081_v22, %v1081_v22  ;;  %v1090_v32 = vmul.f32 %v1082_v24, %v1082_v24 }
 0x778   :  { %v1091_v36 = vmul.f32 %v1083_v26, %v1083_v26 }
 0x779   :  { %v1096_v33 = vadd.f32 %v1089_v30, %v1088_v28  ;;  %v1084_v34 = vsub.f32 %v1599_v20, %v1079_v27  ;;  %v1085_v31 = vsub.f32 %v1604_v3, %v1079_v27  ;;  %v1086_v35 = vsub.f32 %v1601_v5, %v1079_v27 }
 0x77a   :  { %v1087_v38 = vsub.f32 %v1606_v9, %v1079_v27 }
 0x77b   :  { %v1097_v37 = vadd.f32 %v1096_v33, %v1090_v32  ;;  %v1092_v39 = vmul.f32 %v1084_v34, %v1084_v34  ;;  %v1093_v41 = vmul.f32 %v1085_v31, %v1085_v31  ;;  %v1094_v15 = vmul.f32 %v1086_v35, %v1086_v35  ;;  %v1257_v34 = vld [vmem:[%s1689_s0 + $0x20] sm:$0xff]  ;;  %v1258_v35 = vld [vmem:[%s1689_s0 + $0x28] sm:$0xff] }
 0x77c   :  { %v1095_v44 = vmul.f32 %v1087_v38, %v1087_v38 }
 0x77d   :  { %v1098_v42 = vadd.f32 %v1097_v37, %v1091_v36  ;;  %v1101_v43 = vadd.f32 %v1093_v41, %v1092_v39  ;;  %v1259_v37 = vld [vmem:[%s1689_s0 + $0x30] sm:$0xff]  ;;  %v1260_v39 = vld [vmem:[%s1689_s0 + $0x38] sm:$0xff] }
 0x77f   :  { %1099 = vadd.xlane.f32.xlu1 %v1098_v42  ;;  %v1102_v45 = vadd.f32 %v1101_v43, %v1094_v15 }
 0x781   :  { %v1103_v46 = vadd.f32 %v1102_v45, %v1095_v44 }
 0x783   :  { %1104 = vadd.xlane.f32.xlu1 %v1103_v46 }
 0x80c   :  { %v1100_v58 = vpop.xlane.xlu1 %1099 }
 0x80d   :  { %v1106_v47 = vmul.f32 0.001953125, %v1100_v58 }
 0x80f   :  { %v1110_v48 = vadd.f32 1e-05, %v1106_v47 }
 0x810   :  { %v1105_v49 = vpop.xlane.xlu1 %1104 }
 0x811   :  { %1249 = vrsqrt.f32 %v1110_v48  ;;  %v1107_v19 = vmul.f32 0.001953125, %v1105_v49 }
 0x813   :  { %v1111_v29 = vadd.f32 1e-05, %v1107_v19 }
 0x815   :  { %1251 = vrsqrt.f32 %v1111_v29 }
 0x81b   :  { %v1250_v51 = vpop.eup %1249 }
 0x81c   :  { %v1114_v52 = vmul.f32 %v1250_v51, %v1108_v50 }
 0x81e   :  { %1118 = vperm.xlu1 %1243, %v1114_v52   ;;  %v1136_v55 = vmul.f32 %v1114_v52, %v1078_v17 }
 0x81f   :  { %v1252_v56 = vpop.eup %1251 }
 0x820   :  { %v1138_v63 = vsub.f32 %v1134_v53, %v1136_v55  ;;  %v1115_v57 = vmul.f32 %v1252_v56, %v1109_v54 }
 0x822   :  { %1142 = vperm.xlu1 %1243, %v1138_v63   ;;  %1123 = vperm.xlu0 %1244, %v1115_v57   ;;  %v1137_v40 = vmul.f32 %v1115_v57, %v1079_v27 }
 0x824   :  { %v1139_v6 = vsub.f32 %v1135_v21, %v1137_v40 }
 0x826   :  { %1147 = vperm.xlu1 %1243, %v1139_v6  }
 0x89d   :  { %v1119_v59 = vpop.permute.xlu1 %1118 }
 0x89e   :  { %v1126_v60 = vmul.f32 %v1119_v59, %v1589_v2  ;;  %v1127_v61 = vmul.f32 %v1119_v59, %v1593_v18  ;;  %v1128_v62 = vmul.f32 %v1119_v59, %v1591_v16  ;;  %v1129_v0 = vmul.f32 %v1119_v59, %v1595_v7  ;;  %v1253_v16 = vld [vmem:[%s1689_s0] sm:$0xff]  ;;  %v1254_v7 = vld [vmem:[%s1689_s0 + $0x8] sm:$0xff] }
 0x8a1   :  { %v1124_v1 = vpop.permute.xlu0 %1123  ;;  %v1143_v8 = vpop.permute.xlu1 %1142 }
 0x8a2   :  { %v1150_v4 = vadd.f32 %v1143_v8, %v1126_v60  ;;  %v1151_v10 = vadd.f32 %v1143_v8, %v1127_v61  ;;  %v1152_v11 = vadd.f32 %v1143_v8, %v1128_v62  ;;  %v1153_v12 = vadd.f32 %v1143_v8, %v1129_v0 }
 0x8a3   :  { %v1130_v13 = vmul.f32 %v1124_v1, %v1599_v20  ;;  %v1131_v14 = vmul.f32 %v1124_v1, %v1604_v3  ;;  %v1132_v17 = vmul.f32 %v1124_v1, %v1601_v5  ;;  %v1133_v2 = vmul.f32 %v1124_v1, %v1606_v9  ;;  %v1255_v20 = vld [vmem:[%s1689_s0 + $0x10] sm:$0xff]  ;;  %v1256_v5 = vld [vmem:[%s1689_s0 + $0x18] sm:$0xff] }
 0x8a4   :  { %v1158_v18 = vadd.f32 %v1253_v16, %v1150_v4  ;;  %v1159_v23 = vadd.f32 %v1254_v7, %v1151_v10  ;;  %v1160_v22 = vadd.f32 %v1255_v20, %v1152_v11  ;;  %v1161_v3 = vadd.f32 %v1256_v5, %v1153_v12 }
 0x8a5   :  { %v1148_v9 = vpop.permute.xlu1 %1147 }
 0x8a6   :  { %v1154_v24 = vadd.f32 %v1148_v9, %v1130_v13  ;;  %v1155_v25 = vadd.f32 %v1148_v9, %v1131_v14  ;;  %v1156_v26 = vadd.f32 %v1148_v9, %v1132_v17  ;;  %v1157_v27 = vadd.f32 %v1148_v9, %v1133_v2 }
 0x8a7   :  { %v1166_v28 = vmax.f32 %v1158_v18, 0.0  ;;  %v1167_v30 = vmax.f32 %v1159_v23, 0.0  ;;  %v1168_v32 = vmax.f32 %v1160_v22, 0.0  ;;  %v1169_v33 = vmax.f32 %v1161_v3, 0.0 }
 0x8a8   :  { %v1162_v31 = vadd.f32 %v1257_v34, %v1154_v24  ;;  %v1163_v36 = vadd.f32 %v1258_v35, %v1155_v25  ;;  %v1164_v38 = vadd.f32 %v1259_v37, %v1156_v26  ;;  %v1165_v41 = vadd.f32 %v1260_v39, %v1157_v27 }
 0x8a9   :  { %1174 = vst [vmem:[%s1700_s11] sm:$0xff] %v1166_v28  ;;  %1175 = vst [vmem:[%s1700_s11 + $0x8] sm:$0xff] %v1167_v30 }
 0x8aa   :  { %1176 = vst [vmem:[%s1700_s11 + $0x10] sm:$0xff] %v1168_v32  ;;  %1177 = vst [vmem:[%s1700_s11 + $0x18] sm:$0xff] %v1169_v33  ;;  %v1170_v42 = vmax.f32 %v1162_v31, 0.0  ;;  %v1171_v15 = vmax.f32 %v1163_v36, 0.0  ;;  %v1172_v43 = vmax.f32 %v1164_v38, 0.0  ;;  %v1173_v44 = vmax.f32 %v1165_v41, 0.0 }
 0x8ac   :  { %1178 = vst [vmem:[%s1700_s11 + $0x20] sm:$0xff] %v1170_v42  ;;  %1179 = vst [vmem:[%s1700_s11 + $0x28] sm:$0xff] %v1171_v15 }
 0x8ad   :  { %1180 = vst [vmem:[%s1700_s11 + $0x30] sm:$0xff] %v1172_v43  ;;  %1181 = vst [vmem:[%s1700_s11 + $0x38] sm:$0xff] %v1173_v44 }

</bundles_post_ra>
